<compile_context>
chip_gen: v7x
topology: tpu7x:2x2x1
jax: 0.10.0
libtpu: 0.0.40
codegen_flags: <defaults>
</compile_context>

<pallas_src>
import functools

import numpy as np
import jax
import jax.numpy as jnp
from jax import lax
from jax.experimental import pallas as pl
from jax.experimental.pallas import tpu as pltpu

KH = KW = 3          # conv kernel size
PAD = 1              # spatial padding


def _coordconv_kernel(w_ref, xcol_ref, o_ref):
    # w_ref    : (Cout, Kfull)   folded conv weights | coord weights | bias column
    # xcol_ref : (Kfull, N*HW)   im2col patches | constant coord rows | ones row
    # o_ref    : (Cout, N*HW)    lane-dense output (lanes ordered n, h, w)
    o_ref[...] = jnp.dot(w_ref[...], xcol_ref[...],
                         preferred_element_type=jnp.float32)


@functools.partial(jax.jit, static_argnames=("use_bf16",))
def coordconv_forward(x_nchw, weight_oihw, bias, *, use_bf16=False):
    """CoordConv forward.  x_nchw: (N, Cin, H, W) -> (N, Cout, H, W)."""
    N, Cin, H, W = x_nchw.shape
    Cout = weight_oihw.shape[0]
    HW = H * W
    K = KH * KW * Cin                     # batch-dependent taps
    Kfull = K + 2 * KH * KW + 1           # + 18 coord rows + 1 ones (bias) row

    # ---- trace-time constants (numpy -> zero runtime HLO ops) ----------------
    xx = np.broadcast_to(np.linspace(-1.0, 1.0, W, dtype=np.float32)[None, :], (H, W))
    yy = np.broadcast_to(np.linspace(-1.0, 1.0, H, dtype=np.float32)[:, None], (H, W))
    coords = np.pad(np.stack([xx, yy], axis=0),
                    ((0, 0), (PAD, PAD), (PAD, PAD)))             # (2, H+2, W+2)
    coord_rows = np.concatenate(
        [coords[:, kh:kh + H, kw:kw + W].reshape(2, HW)
         for kh in range(KH) for kw in range(KW)], axis=0)        # (18, HW), (kh,kw,c)
    const_rows = np.concatenate(
        [np.tile(coord_rows, (1, N)),                             # same coords per image
         np.ones((1, N * HW), dtype=np.float32)], axis=0)         # (19, N*HW)

    # ---- folded weight matrix: [main taps | coord taps | bias] ---------------
    w_main = jnp.transpose(weight_oihw[:, :Cin], (0, 2, 3, 1)).reshape(Cout, K)
    w_coord = jnp.transpose(weight_oihw[:, Cin:], (0, 2, 3, 1)).reshape(Cout, 2 * KH * KW)
    w_full = jnp.concatenate(
        [w_main, w_coord, bias.astype(jnp.float32)[:, None]], axis=1)   # (Cout, Kfull)

    # ---- im2col patches for the batch-dependent part --------------------------
    # TODO(synk): at production H/W build the taps in-kernel from a halo row
    # strip (memory_space=pl.ANY + manual DMA) to kill the 9x im2col HBM
    # amplification, reintroduce a 2-way "parallel" lane-split axis for v7x's
    # two TensorCores, and flip the GEMM to (N*HW, K)@(K, Cout) once Cout >= 128.
    x_pad = jnp.pad(x_nchw, ((0, 0), (0, 0), (PAD, PAD), (PAD, PAD)))
    taps = [x_pad[:, :, kh:kh + H, kw:kw + W]                      # 9 x (N, Cin, H, W)
            for kh in range(KH) for kw in range(KW)]
    xcol = jnp.transpose(jnp.stack(taps, axis=0),
                         (0, 2, 1, 3, 4)).reshape(K, N * HW)       # rows=(kh,kw,cin)
    xcol_full = jnp.concatenate(
        [xcol, jnp.asarray(const_rows, dtype=xcol.dtype)], axis=0)  # (Kfull, N*HW)

    op_dtype = jnp.bfloat16 if use_bf16 else jnp.float32
    w_full = w_full.astype(op_dtype)
    xcol_full = xcol_full.astype(op_dtype)

    out_flat = pl.pallas_call(
        _coordconv_kernel,
        out_shape=jax.ShapeDtypeStruct((Cout, N * HW), jnp.float32),
        grid=(1,),                               # single step: whole batch in one GEMM
        in_specs=[
            pl.BlockSpec((Cout, Kfull), lambda i: (0, 0)),
            pl.BlockSpec((Kfull, N * HW), lambda i: (0, 0)),
        ],
        out_specs=pl.BlockSpec((Cout, N * HW), lambda i: (0, 0)),
        compiler_params=pltpu.CompilerParams(
            dimension_semantics=("arbitrary",)),
    )(w_full, xcol_full)

    # (Cout, N*HW) -> (N, Cout, H, W)
    out = jnp.transpose(out_flat.reshape(Cout, N, H, W), (1, 0, 2, 3))
    return out.astype(x_nchw.dtype)


def _reference_forward(x_nchw, weight_oihw, bias):
    """Pure-JAX reference (lax.conv) for verification."""
    N, Cin, H, W = x_nchw.shape
    xx = jnp.broadcast_to(jnp.linspace(-1.0, 1.0, W,
                                       dtype=x_nchw.dtype)[None, :], (H, W))
    yy = jnp.broadcast_to(jnp.linspace(-1.0, 1.0, H,
                                       dtype=x_nchw.dtype)[:, None], (H, W))
    xx = jnp.broadcast_to(xx[None, None], (N, 1, H, W))
    yy = jnp.broadcast_to(yy[None, None], (N, 1, H, W))
    x = jnp.concatenate([x_nchw, xx, yy], axis=1)
    out = lax.conv_general_dilated(
        x, weight_oihw, window_strides=(1, 1),
        padding=((PAD, PAD), (PAD, PAD)),
        dimension_numbers=("NCHW", "OIHW", "NCHW"))
    return out + bias[None, :, None, None]


if __name__ == "__main__":
    key = jax.random.PRNGKey(0)
    k_x, k_w, k_b = jax.random.split(key, 3)

    N, Cin, H, W = 2, 4, 16, 16
    Cout = 8

    x = jax.random.normal(k_x, (N, Cin, H, W), dtype=jnp.float32)
    # deterministic synthetic parameters (Conv2d(in_channels + 2, out_channels, 3, padding=1))
    weight = 0.1 * jax.random.normal(k_w, (Cout, Cin + 2, KH, KW),
                                     dtype=jnp.float32)
    bias = 0.1 * jax.random.normal(k_b, (Cout,), dtype=jnp.float32)

    out = jax.block_until_ready(coordconv_forward(x, weight, bias))
    ref = jax.block_until_ready(_reference_forward(x, weight, bias))

    assert out.shape == (N, Cout, H, W)
    assert jnp.allclose(out, ref, atol=1e-4, rtol=1e-4)

    print("KERNEL_OK")
</pallas_src>

<mosaic_0001>
module attributes {stable_mosaic.version = 11 : i64} {
  func.func @_coordconv_kernel(%arg0: i32, %arg1: memref<8x55xf32, #tpu.memory_space<vmem>>, %arg2: memref<55x512xf32, #tpu.memory_space<vmem>>, %arg3: memref<8x512xf32, #tpu.memory_space<vmem>>) attributes {dimension_semantics = [#tpu.dimension_semantics<arbitrary>], iteration_bounds = array<i64: 1>, scalar_prefetch = 0 : i64, scratch_operands = 0 : i64, tpu.core_type = #tpu.core_type<tc>, window_params = [{pipeline_mode = #tpu.pipeline_mode<synchronous>, transform_indices = @transform_0, window_bounds = array<i64: 8, 55>}, {pipeline_mode = #tpu.pipeline_mode<synchronous>, transform_indices = @transform_1, window_bounds = array<i64: 55, 512>}, {pipeline_mode = #tpu.pipeline_mode<synchronous>, transform_indices = @transform_2, window_bounds = array<i64: 8, 512>}]} {
    %c0 = arith.constant 0 : index
    %c0_0 = arith.constant 0 : index
    %0 = vector.load %arg1[%c0, %c0_0] : memref<8x55xf32, #tpu.memory_space<vmem>>, vector<8x55xf32>
    %c0_1 = arith.constant 0 : index
    %c0_2 = arith.constant 0 : index
    %1 = vector.load %arg2[%c0_1, %c0_2] : memref<55x512xf32, #tpu.memory_space<vmem>>, vector<55x512xf32>
    %cst = arith.constant dense<0.000000e+00> : vector<8x512xf32>
    %2 = tpu.matmul %0, %1, %cst {dimension_numbers = #tpu.dot_dimension_numbers<[1], [0], [0], [1], [0, 0, 1, 1], [], []>} : vector<8x55xf32>, vector<55x512xf32>, vector<8x512xf32> -> vector<8x512xf32>
    %c0_3 = arith.constant 0 : index
    %c0_4 = arith.constant 0 : index
    %3 = vector.load %arg3[%c0_3, %c0_4] : memref<8x512xf32, #tpu.memory_space<vmem>>, vector<8x512xf32>
    tpu.vector_store %arg3[%c0_3, %c0_4], %2 {strides = array<i32>} : memref<8x512xf32, #tpu.memory_space<vmem>>, vector<8x512xf32>,
    return
  }
  func.func @transform_0(%arg0: i32) -> (i32, i32) {
    %c0_i32 = arith.constant 0 : i32
    %c0_i32_0 = arith.constant 0 : i32
    %c0_i32_1 = arith.constant 0 : i32
    return %c0_i32, %c0_i32_0 : i32, i32
  }
  func.func @transform_1(%arg0: i32) -> (i32, i32) {
    %c0_i32 = arith.constant 0 : i32
    %c0_i32_0 = arith.constant 0 : i32
    %c0_i32_1 = arith.constant 0 : i32
    return %c0_i32, %c0_i32_0 : i32, i32
  }
  func.func @transform_2(%arg0: i32) -> (i32, i32) {
    %c0_i32 = arith.constant 0 : i32
    %c0_i32_0 = arith.constant 0 : i32
    %c0_i32_1 = arith.constant 0 : i32
    return %c0_i32, %c0_i32_0 : i32, i32
  }
}

</mosaic_0001>

<bundles_post_ra>
// kernel: coordconv_forward.1
= control target key start
LH: loop header
LB: loop body
LE: loop exit
PB: predicated region body
PF: predicated region fallthrough
CT: control target
= control target key end

     0   :  { %v238_v3 = vmov 0.0   ;;  %vm44_vm0 = vcmask 1046528   ;;  %vm40_vm1 = vcmask 449536   ;;  %s353_s1 = inlined_call_operand.vmem [shape: f32[55,512], index: 1, kind: input, shape index: {}]   ;;  %s354_s0 = inlined_call_operand.vmem [shape: f32[8,55], index: 0, kind: input, shape index: {}]   ;;  %s355_s2 = inlined_call_operand.vmem [shape: f32[8,512], index: 2, kind: output, shape index: {}]  }
   0x1   :  { %v13_v0 = vld [vmem:[%s353_s1 + $0x8] sm:$0xff]  ;;  %v15_v2 = vld [vmem:[%s353_s1 + $0x18] sm:$0xff]  ;;  %121 = vmatprep.mubr.f32.mxu0 %v238_v3  ;;  %192 = vmatprep.mubr.f32.mxu1 %v238_v3  ;;  %v12_v6 = vld [vmem:[%s353_s1] sm:$0xff] }
   0x2   :  { %v17_v1 = vld [vmem:[%s353_s1 + $0x28] sm:$0xff]  ;;  %v19_v5 = vld [vmem:[%s353_s1 + $0x38] sm:$0xff]  ;;  %v16_v7 = vld [vmem:[%s353_s1 + $0x20] sm:$0xff] }
   0x3   :  { %v213_v4 = vpack.c.bf16 %v17_v1, %v13_v0  ;;  %v225_v8 = vpack.c.bf16 %v19_v5, %v15_v2  ;;  %v215_v9 = vpack.c.bf16 %v16_v7, %v12_v6  ;;  %v14_v10 = vld [vmem:[%s353_s1 + $0x10] sm:$0xff]  ;;  %v21_v12 = vld [vmem:[%s353_s1 + $0x48] sm:$0xff]  ;;  %v23_v15 = vld [vmem:[%s353_s1 + $0x58] sm:$0xff] }
   0x4   :  { %v18_v11 = vld [vmem:[%s353_s1 + $0x30] sm:$0xff]  ;;  %v25_v14 = vld [vmem:[%s353_s1 + $0x68] sm:$0xff]  ;;  %v27_v16 = vld [vmem:[%s353_s1 + $0x78] sm:$0xff] }
   0x5   :  { %214 = vmatprep.subr.bf16.mxu0 %v213_v4  ;;  %v227_v13 = vpack.c.bf16 %v18_v11, %v14_v10  ;;  %226 = vmatprep.subr.bf16.mxu1 %v225_v8  ;;  %v217_v17 = vpack.c.bf16 %v25_v14, %v21_v12  ;;  %v229_v18 = vpack.c.bf16 %v27_v16, %v23_v15  ;;  %v20_v19 = vld [vmem:[%s353_s1 + $0x40] sm:$0xff]  ;;  %v22_v21 = vld [vmem:[%s353_s1 + $0x50] sm:$0xff]  ;;  %v29_v24 = vld [vmem:[%s353_s1 + $0x88] sm:$0xff] }
   0x6   :  { %216 = vmatpush1.bf16.msra.mxu0 %v215_v9  ;;  %v24_v20 = vld [vmem:[%s353_s1 + $0x60] sm:$0xff]  ;;  %v26_v23 = vld [vmem:[%s353_s1 + $0x70] sm:$0xff]  ;;  %v33_v25 = vld [vmem:[%s353_s1 + $0xa8] sm:$0xff] }
   0x7   :  { %228 = vmatpush1.bf16.msra.mxu1 %v227_v13  ;;  %v219_v22 = vpack.c.bf16 %v24_v20, %v20_v19  ;;  %218 = vmatprep.subr.bf16.mxu0 %v217_v17  ;;  %v231_v26 = vpack.c.bf16 %v26_v23, %v22_v21  ;;  %v221_v27 = vpack.c.bf16 %v33_v25, %v29_v24  ;;  %v31_v28 = vld [vmem:[%s353_s1 + $0x98] sm:$0xff]  ;;  %v28_v30 = vld [vmem:[%s353_s1 + $0x80] sm:$0xff]  ;;  %v30_v33 = vld [vmem:[%s353_s1 + $0x90] sm:$0xff] }
   0x8   :  { %230 = vmatprep.subr.bf16.mxu1 %v229_v18  ;;  %v35_v29 = vld [vmem:[%s353_s1 + $0xb8] sm:$0xff]  ;;  %v32_v32 = vld [vmem:[%s353_s1 + $0xa0] sm:$0xff]  ;;  %v34_v34 = vld [vmem:[%s353_s1 + $0xb0] sm:$0xff] }
   0x9   :  { %v233_v31 = vpack.c.bf16 %v35_v29, %v31_v28  ;;  %v223_v35 = vpack.c.bf16 %v32_v32, %v28_v30  ;;  %v235_v36 = vpack.c.bf16 %v34_v34, %v30_v33  ;;  %v37_v37 = vld [vmem:[%s353_s1 + $0xc8] sm:$0x7f]  ;;  %v39_v38 = vld [vmem:[%s353_s1 + $0xd8] sm:$0x7f]  ;;  %v36_v39 = vld [vmem:[%s353_s1 + $0xc0] sm:$0x7f] }
   0xa   :  { %220 = vmatpush1.bf16.msra.mxu0 %v219_v22  ;;  %v38_v40 = vld [vmem:[%s353_s1 + $0xd0] sm:$0x7f]  ;;  %v11_v41 = vld [vmem:[%s354_s0] sm:$0xff] }
   0xb   :  { %232 = vmatpush1.bf16.msra.mxu1 %v231_v26  ;;  %222 = vmatprep.subr.bf16.mxu0 %v221_v27 }
   0xc   :  { %234 = vmatprep.subr.bf16.mxu1 %v233_v31 }
   0xe   :  { %224 = vmatpush1.bf16.msra.mxu0 %v223_v35 }
   0xf   :  { %236 = vmatpush1.bf16.msra.mxu1 %v235_v36  ;;  %207 = vmatprep.subr.msk.mxu0 %vm44_vm0, %v37_v37 }
  0x10   :  { %210 = vmatprep.subr.msk.mxu1 %vm44_vm0, %v39_v38 }
  0x12   :  { %208 = vmatpush1.msk.msra.mxu0 %vm44_vm0, %v36_v39 }
  0x13   :  { %211 = vmatpush1.msk.msra.mxu1 %vm44_vm0, %v38_v40  ;;  %209 = vmatmul.mubr.msk.f32.vlgmr.msra.gmra.mrb[0].mxu0 %vm40_vm1, %v11_v41 }
  0x14   :  { %212 = vmatmul.mubr.msk.f32.vlgmr.msra.gmra.mrb[0].mxu1 %vm40_vm1, %v11_v41 }
  0xe6   :  { %v123_v42 = vpop.f32.mrb[0].mxu0 }
  0xe7   :  { %199 = vst [vmem:[%s355_s2] sm:$0xff] %v123_v42  ;;  %v194_v43 = vpop.f32.mrb[0].mxu1  ;;  %v125_v44 = vpop.f32.mrb[1].mxu0 }
  0xe8   :  { %201 = vst [vmem:[%s355_s2 + $0x10] sm:$0xff] %v194_v43  ;;  %200 = vst [vmem:[%s355_s2 + $0x8] sm:$0xff] %v125_v44  ;;  %v196_v45 = vpop.f32.mrb[1].mxu1 }
  0xe9   :  { %202 = vst [vmem:[%s355_s2 + $0x18] sm:$0xff] %v196_v45 }

</bundles_post_ra>
